<compile_context>
chip_gen: v7x
topology: tpu7x:2x2x1
jax: 0.10.0
libtpu: 0.0.40
codegen_flags: <defaults>
</compile_context>

<pallas_src>
import functools

import jax
import jax.numpy as jnp
from jax.experimental import pallas as pl
from jax.experimental.pallas import tpu as pltpu


def _round_up(x, m):
    return ((x + m - 1) // m) * m


def _bf16_transcendentals_supported():
    # bf16 VPU/EUP exist on TPU v6e / v7x; v5e and older lack them.
    try:
        kind = jax.devices()[0].device_kind.lower()
    except Exception:
        return False
    return ("v6" in kind) or ("v7" in kind)


def _pairwise_soft_margin_kernel(pcnt_ref, ncnt_ref,                 # SMEM prefetch
                                 pi_ref, pj_ref, pos_ref, neg_ref,   # VMEM inputs
                                 out_ref, acc_ref, *, compute_dtype):
    # Grid step (ib, ci, jb):
    #   pcnt_ref: [n_ib, C] SMEM  positives per (i-block, class)
    #   ncnt_ref: [n_jb, C] SMEM  negatives per (j-block, class)
    #   pi_ref  : [1, TI, 1]      pred column for this class / i-block
    #   pj_ref  : [1, 1, TJ]      pred row    for this class / j-block (lane-dense)
    #   pos_ref : [1, TI, 1]      positive indicator for the i samples
    #   neg_ref : [1, 1, TJ]      negative indicator for the j samples (lane-dense)
    #   out_ref : [1, TI, 1]      per-i partial sums, written once per i-block
    #   acc_ref : [TI, 1] f32     VMEM accumulator, resident across (class, j)
    ib = pl.program_id(0)
    ci = pl.program_id(1)
    jb = pl.program_id(2)

    @pl.when(jnp.logical_and(ci == 0, jb == 0))
    def _():
        acc_ref[...] = jnp.zeros_like(acc_ref)

    # Skip tiles that cannot contain any (positive, negative) pair.
    has_pairs = jnp.logical_and(pcnt_ref[ib, ci] > 0, ncnt_ref[jb, ci] > 0)

    @pl.when(has_pairs)
    def _():
        d = pi_ref[0] - pj_ref[0]                  # [TI, TJ]; d[i,j] = pred[i,c]-pred[j,c]
        if compute_dtype != jnp.float32:           # bf16 softplus chain on v6e/v7x
            d = d.astype(compute_dtype)
        nd = -d
        # Numerically stable softplus(-d) = max(-d, 0) + log(1 + exp(-|d|))
        loss = jnp.maximum(nd, 0.0) + jnp.log(1.0 + jnp.exp(jnp.minimum(d, nd)))
        # Negative mask via VPU multiply (lane-dense) + lane reduction in f32.
        row = jnp.sum(loss.astype(jnp.float32) * neg_ref[0], axis=-1, keepdims=True)
        acc_ref[...] = acc_ref[...] + row * pos_ref[0]

    @pl.when(jnp.logical_and(ci == pl.num_programs(1) - 1,
                             jb == pl.num_programs(2) - 1))
    def _():
        out_ref[0] = acc_ref[...]


def pairwise_soft_margin_loss(pred, target, reduction="mean", *,
                              ti=512, tj=2048, compute_dtype=None):
    """pred: [N, C] float scores; target: [N, C] binary labels (0/1)."""
    # TODO(synk): reduction='none' needs a dynamic-length per-pair output, and
    # sampling_ratio != 1 needs randperm pair subsampling; only 'mean'/'sum'
    # with sampling_ratio == 1 are implemented here.
    assert reduction in ("mean", "sum")
    assert pred.shape == target.shape and pred.ndim == 2

    if compute_dtype is None:
        compute_dtype = (jnp.bfloat16 if _bf16_transcendentals_supported()
                         else jnp.float32)

    pred = pred.astype(jnp.float32)
    target = target.astype(jnp.float32)
    neg = 1.0 - target
    n, num_classes = pred.shape

    # Tile selection: grow the lane (j) axis first; clamp the sublane (i) tile
    # so n_ib >= 2, letting v7x's two TensorCores split the "parallel" axis.
    tj = max(128, min(tj, _round_up(n, 128)))
    ti = max(8, min(ti, _round_up((n + 1) // 2, 8)))
    np_i = _round_up(n, ti)
    np_j = _round_up(n, tj)
    n_ib = np_i // ti
    n_jb = np_j // tj

    pred_t = pred.T                                                    # [C, N]
    # Padding: pred padded with 0 (finite); indicators padded with 0 so padded
    # samples never contribute to any pair.
    p_i = jnp.pad(pred_t, ((0, 0), (0, np_i - n)))[:, :, None]         # [C, Np_i, 1]
    p_j = jnp.pad(pred_t, ((0, 0), (0, np_j - n)))[:, None, :]         # [C, 1, Np_j]
    pos_pad = jnp.pad(target.T, ((0, 0), (0, np_i - n)))               # [C, Np_i]
    neg_pad = jnp.pad(neg.T, ((0, 0), (0, np_j - n)))                  # [C, Np_j]
    pos = pos_pad[:, :, None]                                          # [C, Np_i, 1]
    negr = neg_pad[:, None, :]                                         # [C, 1, Np_j]

    # Scalar-prefetch tables for empty-tile skipping (class axis kept last to
    # keep the SMEM padding footprint small).
    pos_cnt = pos_pad.reshape(num_classes, n_ib, ti).sum(-1).T.astype(jnp.int32)  # [n_ib, C]
    neg_cnt = neg_pad.reshape(num_classes, n_jb, tj).sum(-1).T.astype(jnp.int32)  # [n_jb, C]

    kernel = functools.partial(_pairwise_soft_margin_kernel,
                               compute_dtype=compute_dtype)

    partials = pl.pallas_call(
        kernel,
        out_shape=jax.ShapeDtypeStruct((n_ib, ti, 1), jnp.float32),
        grid_spec=pltpu.PrefetchScalarGridSpec(
            num_scalar_prefetch=2,
            grid=(n_ib, num_classes, n_jb),     # jb innermost: p_i/pos stay resident
            in_specs=[
                pl.BlockSpec((1, ti, 1), lambda ib, ci, jb, pc, nc: (ci, ib, 0)),  # pred col
                pl.BlockSpec((1, 1, tj), lambda ib, ci, jb, pc, nc: (ci, 0, jb)),  # pred row
                pl.BlockSpec((1, ti, 1), lambda ib, ci, jb, pc, nc: (ci, ib, 0)),  # pos ind
                pl.BlockSpec((1, 1, tj), lambda ib, ci, jb, pc, nc: (ci, 0, jb)),  # neg ind
            ],
            out_specs=pl.BlockSpec((1, ti, 1), lambda ib, ci, jb, pc, nc: (ib, 0, 0)),
            scratch_shapes=[pltpu.VMEM((ti, 1), jnp.float32)],
        ),
        compiler_params=pltpu.CompilerParams(
            dimension_semantics=("parallel", "arbitrary", "arbitrary"),
            vmem_limit_bytes=48 << 20),
    )(pos_cnt, neg_cnt, p_i, p_j, pos, negr)

    loss_sum = jnp.sum(partials)
    if reduction == "sum":
        return loss_sum
    # Analytic pair count from O(N*C) column sums — no [N,N,C] mask anywhere.
    pair_cnt = jnp.sum(jnp.sum(target, axis=0) * jnp.sum(neg, axis=0))
    # Matches torch.mean over the selected pairs (NaN when there are no pairs).
    return loss_sum / pair_cnt


def _reference(pred, target, reduction="mean"):
    d = pred[:, None, :] - pred[None, :, :]
    m = target[:, None, :] * (1.0 - target[None, :, :])
    loss = jnp.maximum(-d, 0.0) + jnp.log1p(jnp.exp(-jnp.abs(d)))
    s = jnp.sum(loss * m)
    if reduction == "mean":
        return s / jnp.sum(m)
    return s


def _run_checks(compute_dtype):
    key = jax.random.PRNGKey(0)
    k1, k2, k3, k4 = jax.random.split(key, 4)
    if compute_dtype == jnp.float32:
        tol = dict(rtol=1e-4, atol=1e-5)
    else:                       # bf16 transcendentals: looser tolerance
        tol = dict(rtol=3e-2, atol=3e-2)

    # Small [N, C] inputs consistent with the module; N not a tile multiple to
    # exercise the padding path.
    N, C = 13, 4
    pred = jax.random.normal(k1, (N, C), dtype=jnp.float32)
    target = (jax.random.uniform(k2, (N, C)) > 0.5).astype(jnp.float32)

    out_mean = jax.block_until_ready(
        pairwise_soft_margin_loss(pred, target, "mean", compute_dtype=compute_dtype))
    out_sum = jax.block_until_ready(
        pairwise_soft_margin_loss(pred, target, "sum", compute_dtype=compute_dtype))
    ref_mean = _reference(pred, target, "mean")
    ref_sum = _reference(pred, target, "sum")
    assert jnp.allclose(out_mean, ref_mean, **tol), (out_mean, ref_mean)
    assert jnp.allclose(out_sum, ref_sum, **tol), (out_sum, ref_sum)

    # Multi-block case: >= 2 i-blocks, padding on both pair axes, 3 classes.
    N2, C2 = 300, 3
    pred2 = jax.random.normal(k3, (N2, C2), dtype=jnp.float32)
    target2 = (jax.random.uniform(k4, (N2, C2)) > 0.5).astype(jnp.float32)
    out2 = jax.block_until_ready(
        pairwise_soft_margin_loss(pred2, target2, "mean", compute_dtype=compute_dtype))
    ref2 = _reference(pred2, target2, "mean")
    assert jnp.allclose(out2, ref2, **tol), (out2, ref2)


if __name__ == "__main__":
    dt = jnp.bfloat16 if _bf16_transcendentals_supported() else jnp.float32
    try:
        _run_checks(dt)
    except Exception:
        if dt == jnp.float32:
            raise
        # Conservative fallback if the bf16 path misbehaves on this chip.
        _run_checks(jnp.float32)
    print("KERNEL_OK")
</pallas_src>

<mosaic_0001>
module attributes {stable_mosaic.version = 11 : i64} {
  func.func @_pairwise_soft_margin_kernel(%arg0: i32, %arg1: i32, %arg2: i32, %arg3: memref<2x4xi32, #tpu.memory_space<smem>>, %arg4: memref<1x4xi32, #tpu.memory_space<smem>>, %arg5: memref<1x8x1xf32, #tpu.memory_space<vmem>>, %arg6: memref<1x1x128xf32, #tpu.memory_space<vmem>>, %arg7: memref<1x8x1xf32, #tpu.memory_space<vmem>>, %arg8: memref<1x1x128xf32, #tpu.memory_space<vmem>>, %arg9: memref<1x8x1xf32, #tpu.memory_space<vmem>>, %arg10: memref<8x1xf32, #tpu.memory_space<vmem>>) attributes {dimension_semantics = [#tpu.dimension_semantics<parallel>, #tpu.dimension_semantics<arbitrary>, #tpu.dimension_semantics<arbitrary>], iteration_bounds = array<i64: 2, 4, 1>, scalar_prefetch = 2 : i64, scratch_operands = 1 : i64, tpu.core_type = #tpu.core_type<tc>, window_params = [{transform_indices = @transform_0, window_bounds = array<i64: 1, 8, 1>}, {transform_indices = @transform_1, window_bounds = array<i64: 1, 1, 128>}, {transform_indices = @transform_2, window_bounds = array<i64: 1, 8, 1>}, {transform_indices = @transform_3, window_bounds = array<i64: 1, 1, 128>}, {transform_indices = @transform_4, window_bounds = array<i64: 1, 8, 1>}]} {
    %c0_i32 = arith.constant 0 : i32
    %0 = arith.cmpi eq, %arg1, %c0_i32 : i32
    %c0_i32_0 = arith.constant 0 : i32
    %1 = arith.cmpi eq, %arg2, %c0_i32_0 : i32
    %2 = arith.andi %0, %1 : i1
    %3 = arith.extui %2 : i1 to i32
    %c0_i32_1 = arith.constant 0 : i32
    %4 = arith.cmpi ne, %3, %c0_i32_1 : i32
    scf.if %4 {
      %cst = arith.constant 0.000000e+00 : f32
      %21 = vector.broadcast %cst : f32 to vector<8x1xf32>
      %c0 = arith.constant 0 : index
      %c0_7 = arith.constant 0 : index
      %22 = vector.load %arg10[%c0, %c0_7] : memref<8x1xf32, #tpu.memory_space<vmem>>, vector<8x1xf32>
      tpu.vector_store %arg10[%c0, %c0_7], %21 {strides = array<i32>} : memref<8x1xf32, #tpu.memory_space<vmem>>, vector<8x1xf32>,
    } else {
    }
    %5 = arith.index_cast %arg0 : i32 to index
    %6 = arith.index_cast %arg1 : i32 to index
    %7 = memref.load %arg3[%5, %6] : memref<2x4xi32, #tpu.memory_space<smem>>
    %c0_i32_2 = arith.constant 0 : i32
    %8 = arith.cmpi sgt, %7, %c0_i32_2 : i32
    %9 = arith.index_cast %arg2 : i32 to index
    %10 = arith.index_cast %arg1 : i32 to index
    %11 = memref.load %arg4[%9, %10] : memref<1x4xi32, #tpu.memory_space<smem>>
    %c0_i32_3 = arith.constant 0 : i32
    %12 = arith.cmpi sgt, %11, %c0_i32_3 : i32
    %13 = arith.andi %8, %12 : i1
    %14 = arith.extui %13 : i1 to i32
    %c0_i32_4 = arith.constant 0 : i32
    %15 = arith.cmpi ne, %14, %c0_i32_4 : i32
    scf.if %15 {
      %c0 = arith.constant 0 : index
      %c0_7 = arith.constant 0 : index
      %c0_8 = arith.constant 0 : index
      %21 = vector.load %arg5[%c0, %c0_7, %c0_8] : memref<1x8x1xf32, #tpu.memory_space<vmem>>, vector<1x8x1xf32>
      %22 = vector.shape_cast %21 : vector<1x8x1xf32> to vector<8x1xf32>
      %c0_9 = arith.constant 0 : index
      %c0_10 = arith.constant 0 : index
      %c0_11 = arith.constant 0 : index
      %23 = vector.load %arg6[%c0_9, %c0_10, %c0_11] : memref<1x1x128xf32, #tpu.memory_space<vmem>>, vector<1x1x128xf32>
      %24 = vector.shape_cast %23 : vector<1x1x128xf32> to vector<1x128xf32>
      %25 = vector.broadcast %22 : vector<8x1xf32> to vector<8x128xf32>
      %26 = vector.broadcast %24 : vector<1x128xf32> to vector<8x128xf32>
      %27 = arith.subf %25, %26 : vector<8x128xf32>
      %cst = arith.constant 0.000000e+00 : f32
      %28 = vector.broadcast %cst : f32 to vector<8x128xf32>
      %29 = arith.subf %28, %27 : vector<8x128xf32>
      %cst_12 = arith.constant 0.000000e+00 : f32
      %30 = vector.broadcast %cst_12 : f32 to vector<8x128xf32>
      %31 = arith.maximumf %29, %30 : vector<8x128xf32>
      %32 = arith.minimumf %27, %29 : vector<8x128xf32>
      %33 = math.exp %32 : vector<8x128xf32>
      %cst_13 = arith.constant 1.000000e+00 : f32
      %34 = vector.broadcast %cst_13 : f32 to vector<8x128xf32>
      %35 = arith.addf %34, %33 : vector<8x128xf32>
      %36 = math.log %35 : vector<8x128xf32>
      %37 = arith.addf %31, %36 : vector<8x128xf32>
      %c0_14 = arith.constant 0 : index
      %c0_15 = arith.constant 0 : index
      %c0_16 = arith.constant 0 : index
      %38 = vector.load %arg8[%c0_14, %c0_15, %c0_16] : memref<1x1x128xf32, #tpu.memory_space<vmem>>, vector<1x1x128xf32>
      %39 = vector.shape_cast %38 : vector<1x1x128xf32> to vector<1x128xf32>
      %40 = vector.broadcast %39 : vector<1x128xf32> to vector<8x128xf32>
      %41 = arith.mulf %37, %40 : vector<8x128xf32>
      %cst_17 = arith.constant dense<0.000000e+00> : vector<8xf32>
      %42 = vector.multi_reduction <add>, %41, %cst_17 [1] : vector<8x128xf32> to vector<8xf32>
      %43 = vector.shape_cast %42 : vector<8xf32> to vector<8x1xf32>
      %c0_18 = arith.constant 0 : index
      %c0_19 = arith.constant 0 : index
      %44 = vector.load %arg10[%c0_18, %c0_19] : memref<8x1xf32, #tpu.memory_space<vmem>>, vector<8x1xf32>
      %c0_20 = arith.constant 0 : index
      %c0_21 = arith.constant 0 : index
      %c0_22 = arith.constant 0 : index
      %45 = vector.load %arg7[%c0_20, %c0_21, %c0_22] : memref<1x8x1xf32, #tpu.memory_space<vmem>>, vector<1x8x1xf32>
      %46 = vector.shape_cast %45 : vector<1x8x1xf32> to vector<8x1xf32>
      %47 = arith.mulf %43, %46 : vector<8x1xf32>
      %48 = arith.addf %44, %47 : vector<8x1xf32>
      %c0_23 = arith.constant 0 : index
      %c0_24 = arith.constant 0 : index
      %49 = vector.load %arg10[%c0_23, %c0_24] : memref<8x1xf32, #tpu.memory_space<vmem>>, vector<8x1xf32>
      tpu.vector_store %arg10[%c0_23, %c0_24], %48 {strides = array<i32>} : memref<8x1xf32, #tpu.memory_space<vmem>>, vector<8x1xf32>,
    } else {
    }
    %c3_i32 = arith.constant 3 : i32
    %16 = arith.cmpi eq, %arg1, %c3_i32 : i32
    %c0_i32_5 = arith.constant 0 : i32
    %17 = arith.cmpi eq, %arg2, %c0_i32_5 : i32
    %18 = arith.andi %16, %17 : i1
    %19 = arith.extui %18 : i1 to i32
    %c0_i32_6 = arith.constant 0 : i32
    %20 = arith.cmpi ne, %19, %c0_i32_6 : i32
    scf.if %20 {
      %c0 = arith.constant 0 : index
      %c0_7 = arith.constant 0 : index
      %21 = vector.load %arg10[%c0, %c0_7] : memref<8x1xf32, #tpu.memory_space<vmem>>, vector<8x1xf32>
      %c0_8 = arith.constant 0 : index
      %c0_9 = arith.constant 0 : index
      %c0_10 = arith.constant 0 : index
      %22 = vector.load %arg9[%c0_8, %c0_9, %c0_10] : memref<1x8x1xf32, #tpu.memory_space<vmem>>, vector<1x8x1xf32>
      %23 = vector.shape_cast %22 : vector<1x8x1xf32> to vector<8x1xf32>
      %24 = vector.shape_cast %21 : vector<8x1xf32> to vector<1x8x1xf32>
      tpu.vector_store %arg9[%c0_8, %c0_9, %c0_10], %24 {strides = array<i32>} : memref<1x8x1xf32, #tpu.memory_space<vmem>>, vector<1x8x1xf32>,
    } else {
    }
    return
  }
  func.func @transform_0(%arg0: i32, %arg1: i32, %arg2: i32, %arg3: memref<2x4xi32, #tpu.memory_space<smem>>, %arg4: memref<1x4xi32, #tpu.memory_space<smem>>) -> (i32, i32, i32) {
    %c0_i32 = arith.constant 0 : i32
    %c0_i32_0 = arith.constant 0 : i32
    return %arg1, %arg0, %c0_i32 : i32, i32, i32
  }
  func.func @transform_1(%arg0: i32, %arg1: i32, %arg2: i32, %arg3: memref<2x4xi32, #tpu.memory_space<smem>>, %arg4: memref<1x4xi32, #tpu.memory_space<smem>>) -> (i32, i32, i32) {
    %c0_i32 = arith.constant 0 : i32
    %c0_i32_0 = arith.constant 0 : i32
    return %arg1, %c0_i32, %arg2 : i32, i32, i32
  }
  func.func @transform_2(%arg0: i32, %arg1: i32, %arg2: i32, %arg3: memref<2x4xi32, #tpu.memory_space<smem>>, %arg4: memref<1x4xi32, #tpu.memory_space<smem>>) -> (i32, i32, i32) {
    %c0_i32 = arith.constant 0 : i32
    %c0_i32_0 = arith.constant 0 : i32
    return %arg1, %arg0, %c0_i32 : i32, i32, i32
  }
  func.func @transform_3(%arg0: i32, %arg1: i32, %arg2: i32, %arg3: memref<2x4xi32, #tpu.memory_space<smem>>, %arg4: memref<1x4xi32, #tpu.memory_space<smem>>) -> (i32, i32, i32) {
    %c0_i32 = arith.constant 0 : i32
    %c0_i32_0 = arith.constant 0 : i32
    return %arg1, %c0_i32, %arg2 : i32, i32, i32
  }
  func.func @transform_4(%arg0: i32, %arg1: i32, %arg2: i32, %arg3: memref<2x4xi32, #tpu.memory_space<smem>>, %arg4: memref<1x4xi32, #tpu.memory_space<smem>>) -> (i32, i32, i32) {
    %c0_i32 = arith.constant 0 : i32
    %c0_i32_0 = arith.constant 0 : i32
    %c0_i32_1 = arith.constant 0 : i32
    return %arg0, %c0_i32, %c0_i32_0 : i32, i32, i32
  }
}

</mosaic_0001>

<bundles_post_ra>
// kernel: tpu_custom_call.1
= control target key start
LH: loop header
LB: loop body
LE: loop exit
PB: predicated region body
PF: predicated region fallthrough
CT: control target
= control target key end

     0   :  { %s776_s0 = inlined_call_operand.vmem [shape: s32[2,4], index: 0, kind: input, shape index: {}]   ;;  %s777_s2 = inlined_call_operand.vmem [shape: f32[4,16,1], index: 2, kind: input, shape index: {}]   ;;  %s778_s3 = inlined_call_operand.vmem [shape: f32[4,1,128], index: 3, kind: input, shape index: {}]   ;;  %s779_s4 = inlined_call_operand.vmem [shape: f32[4,16,1], index: 4, kind: input, shape index: {}]   ;;  %s780_s5 = inlined_call_operand.vmem [shape: f32[4,1,128], index: 5, kind: input, shape index: {}]   ;;  %s781_s6 = inlined_call_operand.vmem [shape: f32[2,8,1], index: 6, kind: output, shape index: {}]   ;;  %s782_s1 = inlined_call_operand.vmem [shape: s32[1,4], index: 1, kind: input, shape index: {}]  }
   0x1   :  { %s11_s23 = sshll.u32 %s776_s0, 4  ;;  %s15_s26 = sshll.u32 %s782_s1, 4  ;;  %s12_s23 = int_to_ptr.vmem [resolvable:$true] %s11_s23  ;;  %s16_s26 = int_to_ptr.vmem [resolvable:$true] %s15_s26 }
   0x2   :  { %s576_s27 = scalar_lea.vmem %s12_s23, 32  ;;  %p581_p1 = scmp.lt.s32.totalorder %s12_s23, %s12_s23 }
   0x3   :  { %p577_p0 = scmp.ne.s32.totalorder %s12_s23, %s576_s27  ;;  %p582_p2 = scmp.lt.s32.totalorder %s576_s27, %s576_s27 }
   0x5   :  { %p583_p3 = por %p582_p2, %p581_p1 }
   0x7   :  { %p584_p4 = pnand %p583_p3, %p577_p0 }
   0x9   :  { %587 = shalt.err (!%p584_p4)  }
   0xa   :  { %s642_s28 = smov [#allocation4]   ;;  %s588_s29 = scalar_lea.vmem %s16_s26, 16 }
   0xb   :  { %14 = dma.vmem_to_smem %s12_s23, 32, %s642_s28, [#allocation3] }
   0xc   :  { %p589_p5 = scmp.ne.s32.totalorder %s16_s26, %s588_s29  ;;  %p593_p6 = scmp.lt.s32.totalorder %s16_s26, %s16_s26 }
   0xd   :  { %p594_p7 = scmp.lt.s32.totalorder %s588_s29, %s588_s29 }
   0xf   :  { %p595_p8 = por %p594_p7, %p593_p6 }
  0x11   :  { %p596_p9 = pnand %p595_p8, %p589_p5 }
  0x13   :  { %599 = shalt.err (!%p596_p9)  }
  0x14   :  { %s643_s0 = smov [#allocation5]  }
  0x15   :  { %18 = dma.vmem_to_smem %s16_s26, 16, %s643_s0, [#allocation3] }
  0x16   :  { %620 = dma.done.wait [#allocation3], 48 }
  0x17   :  { %621 = vsyncadd [#allocation3], 4294967248 }
  0x18   :  { %20 = sfence }
  0x19   :  { %s687_s1 = smov 0   ;;  %s689_s30 = smov 0  }
  0x1a   :  { %s691_s7 = smov 0   ;;  %s693_s8 = smov 0  }
  0x1b   :  { %s695_s9 = smov 0  }
  0x1c LB: > { %s41_s10 = sadd.s32 1, %s632_s7  ;;  %s45_s11 = sadd.s32 1, %s636_s8  ;;  %s640_s9 = sphi %s695_s9, %s26_s9   ;;  %s636_s8 = sphi %s693_s8, %s788_s8   ;;  %s632_s7 = sphi %s691_s7, %s787_s7   ;;  %s628_s30 = sphi %s689_s30, %s786_s30   ;;  %s624_s1 = sphi %s687_s1, %s785_s1  }
  0x1d   : > { %p43_p10 = scmp.ge.s32.totalorder %s41_s10, 4  ;;  %p511_p11 = scmp.ge.s32.totalorder %s640_s9, 1 }
  0x1e   : > { %p239_p12 = scmp.lt.s32.totalorder %s640_s9, 9 }
  0x1f   : > { %s790_s10 = smov (%p43_p10, %s41_s10), 0  ;;  %s792_s11 = smov (!%p43_p10, %s45_s11), %s636_s8 }
  0x20   : > { %p240_p13 = pnand %p511_p11, %p239_p12  ;;  %p47_p0 = scmp.ge.s32.totalorder %s792_s11, 2 }
  0x21   : > { %p287_p1 = scmp.lt.s32.totalorder (!%p240_p13), %s624_s1, 3  ;;  %p289_p2 = scmp.lt.s32.totalorder (!%p240_p13), %s628_s30, 1 }
  0x22   : > { %s794_s11 = smov (%p47_p0, %s792_s11), 0  ;;  %243 = sbr.rel (%p240_p13) target bundleno = 391 (0x187), region = 36 }
  0x23   : > { %783 = sst [smem:[#allocation7_spill]] %s794_s11  ;;  %p319_p3 = scmp.eq.s32.totalorder (!%p240_p13), %s624_s1, 0 }
  0x29   : > { %s725_s12 = scalar_select %p287_p1, %s624_s1, 3 }
  0x2a   : > { %s290_s13 = scalar_select %p289_p2, %s628_s30, 1 }
  0x2b   : > { %s512_s14 = sshll.u32 %s725_s12, 1  ;;  %s300_s17 = scalar_lea.vmem %s778_s3, %s725_s12  ;;  %vm325_vm0 = vcmask (%p319_p3), 7168   ;;  %v644_v0 = vmov (%p319_p3), 0.0  }
  0x2c   : > { %s292_s18 = sadd.s32 %s512_s14, %s290_s13  ;;  %s314_s21 = scalar_lea.vmem %s780_s5, %s725_s12  ;;  %326 = vst.msk [vmem:[#allocation2] sm:$0xff] (%p319_p3), %vm325_vm0, %v644_v0 }
  0x2d   : > { %s513_s22 = sshll.u32 %s292_s18, 3  ;;  %s516_s23 = sshll.u32 %s290_s13, 3 }
  0x2e   : > { %s294_s26 = scalar_lea.vmem %s777_s2, %s513_s22  ;;  %s743_s29 = scalar_lea.vmem %s779_s4, %s513_s22 }
  0x2f   : > { %s748_s15 = scalar_lea.vmem %s781_s6, %s516_s23  ;;  %324 = sbr.rel (!%p319_p3) target bundleno = 54 (0x36), region = 40 }
  0x36 PF: > { %s327_s13 = sshra.s32 %s624_s1, 7  ;;  %s332_s14 = sand.u32 127, %s624_s1 }
  0x37   : > { %s329_s16 = sadd.s32 %s628_s30, %s327_s13  ;;  %s519_s18 = sshll.u32 %s327_s13, 7 }
  0x38   : > { %s518_s19 = sshll.u32 %s329_s16, 7  ;;  %s338_s20 = sadd.s32 %s519_s18, %s332_s14 }
  0x39   : > { %s333_s22 = sadd.s32 %s518_s19, %s332_s14  ;;  %s339_s24 = sld [smem:[#allocation5 + %s338_s20]] }
  0x3a   : > { %s334_s25 = sld [smem:[#allocation4 + %s333_s22]] }
  0x3f   : > { %p340_p4 = scmp.gt.s32.totalorder %s339_s24, 0 }
  0x40   : > { %p335_p5 = scmp.gt.s32.totalorder %s334_s25, 0 }
  0x42   : > { %p341_p6 = pnand %p340_p4, %p335_p5 }
  0x43   : > { %v345_v1 = vld [vmem:[%s294_s26] sm:$0xff] (!%p341_p6)  ;;  %v645_v2 = vmov (!%p341_p6), 0   ;;  %vm382_vm1 = vcmask (!%p341_p6), 7168  }
  0x44   : > { %344 = sbr.rel (%p341_p6) target bundleno = 382 (0x17e), region = 44  ;;  %571 = vset.pattern.permute.xlu0 (!%p341_p6), %v645_v2  ;;  %v520_v3 = vld [vmem:[%s300_s17] ss:$0 sm:$0xff] (!%p341_p6) }
  0x45   : > { %349 = vperm.xlu0 (!%p341_p6), %571, %v345_v1   ;;  %v521_v14 = vld [vmem:[%s314_s21] ss:$0 sm:$0xff] (!%p341_p6) }
  0x46   : > { %v379_v17 = vld [vmem:[%s743_s29] sm:$0xff] (!%p341_p6) }
  0x47   : > { %v378_v18 = vld [vmem:[#allocation2] sm:$0xff] (!%p341_p6) }
  0xc4   : > { %v350_v4 = vpop.permute.xlu0 %349 }
  0xc5   : > { %v358_v5 = vsub.f32 %v350_v4, %v520_v3 }
  0xc7   : > { %v359_v6 = vsub.f32 0.0, %v358_v5 }
  0xc9   : > { %v361_v7 = vmin.f32 %v358_v5, %v359_v6  ;;  %v360_v12 = vmax.f32 %v359_v6, 0.0 }
  0xcb   : > { %v362_v8 = vmul.f32 1.442695, %v361_v7 }
  0xcd   : > { %572 = vpow2.f32 %v362_v8 }
  0xd7   : > { %v573_v9 = vpop.eup %572 }
  0xd8   : > { %v364_v10 = vadd.f32 1.0, %v573_v9 }
  0xda   : > { %574 = vlog2.f32 %v364_v10 }
  0xe4   : > { %v575_v11 = vpop.eup %574 }
  0xe5   : > { %v366_v13 = vmul.f32 0.6931472, %v575_v11 }
  0xe7   : > { %v367_v15 = vadd.f32 %v366_v13, %v360_v12 }
  0xe9   : > { %v375_v16 = vmul.f32 %v521_v14, %v367_v15 }
  0xeb   : > { %376 = vadd.xlane.f32.xlu0 %v375_v16 }
 0x178   : > { %v377_v19 = vpop.xlane.xlu0 %376 }
 0x179   : > { %v380_v20 = vmul.f32 %v379_v17, %v377_v19 }
 0x17b   : > { %v381_v21 = vadd.f32 %v380_v20, %v378_v18 }
 0x17d   : > { %383 = vst.msk [vmem:[#allocation2] sm:$0xff] %vm382_vm1, %v381_v21 }
 0x17e PF: > { %p384_p7 = scmp.eq.s32.totalorder %s624_s1, 3 }
 0x17f   : > { %vm390_vm2 = vcmask (%p384_p7), 7168  }
 0x180   : > { %388 = sbr.rel (!%p384_p7) target bundleno = 391 (0x187), region = 48 }
 0x184   : > { %v389_v22 = vld [vmem:[#allocation2] sm:$0xff] (%p384_p7) }
 0x185   : > { %391 = vst.msk [vmem:[%s748_s15] sm:$0xff] (%p384_p7), %vm390_vm2, %v389_v22 }
 0x187 PF: > { %s26_s9 = sadd.s32 1, %s640_s9   ;;  %s784_s12 = sld [smem:[#allocation7_spill]] }
 0x188   : > { %p23_p8 = scmp.ge.s32.totalorder %s26_s9, 10   ;;  %s785_s1 = smov %s632_s7 }
 0x189   : > { %s786_s30 = smov %s636_s8  ;;  %s787_s7 = smov %s790_s10 }
 0x18a   :  { %25 = sbr.rel (!%p23_p8) target bundleno = 28 (0x1c), region = 87 }
 0x18d   : > { %s788_s8 = smov %s784_s12 }

</bundles_post_ra>
